<compile_context>
chip_gen: v6e
topology: v6e:2x2x1
jax: 0.10.0
libtpu: 0.0.40
codegen_flags: <defaults>
</compile_context>

<pallas_src>
import functools

import jax
import jax.numpy as jnp
import numpy as np
from jax import lax
from jax.experimental import pallas as pl
from jax.experimental.pallas import tpu as pltpu


@functools.lru_cache(maxsize=None)
def _num_tensorcores():
    """Best-effort TensorCores-per-chip.

    Falls back to 2: phantom blocks are compute-skipped inside the kernel, so
    over-splitting on a 1-TC chip costs at most one redundant tile DMA, while
    under-splitting on a 2-TC chip (v7x) would halve throughput.
    """
    try:
        info = pltpu.get_tpu_info()
    except Exception:
        return 2
    for attr in ("num_cores", "core_count", "num_tensorcores",
                 "tensor_core_count", "cores_per_chip"):
        val = getattr(info, attr, None)
        if isinstance(val, int) and 1 <= val <= 8:
            return val
    return 2


def _bce_sum_kernel(x_ref, y_ref, o_ref, *, rows, tile_rows, lanew, inner,
                    nblocks, need_mask):
    """Accumulate un-negated BCE partial sums into the resident output block.

    x_ref, y_ref : (tile_rows, lanew) tiles of predictions / targets.
    o_ref        : (8, lanew) per-core partial sums, resident across the
                   "arbitrary" reduction grid axis (index map ignores i).
    """
    c = pl.program_id(0)                       # "parallel" core axis
    i = pl.program_id(1)                       # "arbitrary" reduction axis
    blk = c * inner + i                        # logical block id

    @pl.when(i == 0)
    def _init():
        o_ref[...] = jnp.zeros_like(o_ref)

    @pl.when(blk < nblocks)                    # skip phantom (clamped) blocks
    def _compute():
        x = x_ref[...].astype(jnp.float32)
        y = y_ref[...].astype(jnp.float32)
        # PyTorch BCELoss clamps each log term at -100.
        log_x = jnp.maximum(jnp.log(x), -100.0)
        log_1mx = jnp.maximum(jnp.log1p(-x), -100.0)
        # Un-negated BCE: y*log(x) + (1-y)*log(1-x).  Negate + 1/N in epilogue.
        contrib = log_1mx + y * (log_x - log_1mx)

        def _accumulate(vals):
            # (tile_rows, lanew) -> (8, lanew): sublane-group fold, pure VPU
            # adds (no cross-lane / XLU work inside the grid loop).
            o_ref[...] += vals.reshape(tile_rows // 8, 8, lanew).sum(axis=0)

        if need_mask:
            is_tail = blk == nblocks - 1

            @pl.when(is_tail)
            def _tail():
                # Zero out padded/overhanging rows of the final block.  Garbage
                # there may be NaN; jnp.where (select) discards it safely.
                row_in_blk = lax.broadcasted_iota(
                    jnp.int32, (tile_rows, lanew), 0)
                global_row = blk * tile_rows + row_in_blk
                _accumulate(jnp.where(global_row < rows, contrib, 0.0))

            @pl.when(jnp.logical_not(is_tail))
            def _full():
                _accumulate(contrib)
        else:
            _accumulate(contrib)


def _bce_sum_tail_xla(x, y):
    """Tiny un-negated BCE sum for the sub-lane-width ragged tail."""
    x = x.astype(jnp.float32)
    y = y.astype(jnp.float32)
    log_x = jnp.maximum(jnp.log(x), -100.0)
    log_1mx = jnp.maximum(jnp.log1p(-x), -100.0)
    return jnp.sum(log_1mx + y * (log_x - log_1mx))


def _bce_mean_pallas(x, y, *, block_bytes=6 * 1024 * 1024):
    """mean(BCE(x, y)) over every element; x holds probabilities in [0, 1]."""
    assert x.shape == y.shape, (x.shape, y.shape)
    total = int(np.prod(x.shape))
    if total == 0:
        return jnp.float32(jnp.nan)            # matches torch's mean over empty

    # Lane-dense width: largest of {512, 256, 128} dividing the element count
    # (then the reshape below is a free bitcast, no copy).  Otherwise use 128
    # and fold the <128-element tail in with plain XLA (no full-tensor pad).
    lanew = next((c for c in (512, 256, 128) if total % c == 0), 128)
    main = (total // lanew) * lanew
    rows = main // lanew

    xf = x.reshape(-1)
    yf = y.reshape(-1)

    partial_sums = []
    if main != total:
        partial_sums.append(_bce_sum_tail_xla(xf[main:], yf[main:]))

    if rows > 0:
        if main == total:
            x2, y2 = xf.reshape(rows, lanew), yf.reshape(rows, lanew)
        else:
            x2 = xf[:main].reshape(rows, lanew)
            y2 = yf[:main].reshape(rows, lanew)

        x_item = jnp.dtype(x.dtype).itemsize
        y_item = jnp.dtype(y.dtype).itemsize
        # Sublane alignment for the (8,128)/(16,128)/(32,128) tiling constraint.
        sub_align = max(8, 32 // min(x_item, y_item))
        # Budget rows at f32 width: the in-kernel f32 intermediates are the
        # binding VMEM term, so block_bytes ~ one f32 tile.  Narrow (bf16/int8)
        # inputs then simply move fewer HBM bytes per step (the intended win).
        block_rows = (block_bytes // (4 * lanew)) // sub_align * sub_align
        block_rows = max(block_rows, sub_align)

        # Tile rows always a multiple of sub_align (kernel folds in groups of 8);
        # any overhang on the last block is cleaned up by the in-kernel mask.
        rows_padded = -(-rows // sub_align) * sub_align
        tile_rows = min(block_rows, rows_padded)
        nblocks = -(-rows // tile_rows)
        need_mask = (rows % tile_rows) != 0

        ncores = max(1, min(_num_tensorcores(), nblocks))
        inner = -(-nblocks // ncores)

        def in_map(c, i):
            # Clamp so phantom trailing blocks never DMA out of bounds; their
            # compute is skipped inside the kernel.
            return (jnp.minimum(c * inner + i, nblocks - 1), 0)

        kernel = functools.partial(
            _bce_sum_kernel, rows=rows, tile_rows=tile_rows, lanew=lanew,
            inner=inner, nblocks=nblocks, need_mask=need_mask)

        partials = pl.pallas_call(
            kernel,
            out_shape=jax.ShapeDtypeStruct((8 * ncores, lanew), jnp.float32),
            grid_spec=pltpu.PrefetchScalarGridSpec(
                num_scalar_prefetch=0,
                grid=(ncores, inner),
                in_specs=[
                    pl.BlockSpec((tile_rows, lanew), in_map),
                    pl.BlockSpec((tile_rows, lanew), in_map),
                ],
                out_specs=pl.BlockSpec((8, lanew), lambda c, i: (c, 0)),
            ),
            compiler_params=pltpu.CompilerParams(
                dimension_semantics=("parallel", "arbitrary"),
                vmem_limit_bytes=48 * 1024 * 1024,
            ),
        )(x2, y2)

        partial_sums.append(jnp.sum(partials))

    total_sum = partial_sums[0]
    for s in partial_sums[1:]:
        total_sum = total_sum + s
    # Single negation + mean scale (kernel accumulated the un-negated sum).
    return -total_sum * jnp.float32(1.0 / total)


def cross_entropy(output, mask, color=False):
    """Forward pass of the CrossEntropy module (nn.BCELoss, reduction='mean')."""
    # TODO(synk): the torch module's NaN-check + pdb.set_trace() debugging hooks
    # have no kernel equivalent and are omitted.
    if color:
        target = mask
    else:
        tmp = mask[:, 0, :, :]
        target = tmp.reshape(tmp.shape[0], 1, tmp.shape[1], tmp.shape[2])
    return _bce_mean_pallas(output, target)


def _bce_mean_ref(x, y):
    x = x.astype(jnp.float32)
    y = y.astype(jnp.float32)
    log_x = jnp.maximum(jnp.log(x), -100.0)
    log_1mx = jnp.maximum(jnp.log1p(-x), -100.0)
    return jnp.mean(-(y * log_x + (1.0 - y) * log_1mx))


if __name__ == "__main__":
    keys = jax.random.split(jax.random.PRNGKey(0), 10)
    B, C, H, W = 2, 4, 16, 16

    # color=False: output (B,1,H,W) probabilities vs channel 0 of mask (B,C,H,W).
    out_gray = jax.nn.sigmoid(jax.random.normal(keys[0], (B, 1, H, W), jnp.float32))
    msk_gray = (jax.random.uniform(keys[1], (B, C, H, W)) > 0.5).astype(jnp.float32)
    got = jax.block_until_ready(cross_entropy(out_gray, msk_gray, color=False))
    ref = _bce_mean_ref(out_gray, msk_gray[:, 0:1, :, :])
    np.testing.assert_allclose(np.asarray(got), np.asarray(ref), rtol=1e-5, atol=1e-6)

    # color=True: output and mask both (B,C,H,W).
    out_col = jax.nn.sigmoid(jax.random.normal(keys[2], (B, C, H, W), jnp.float32))
    msk_col = jax.random.uniform(keys[3], (B, C, H, W), jnp.float32)
    got = jax.block_until_ready(cross_entropy(out_col, msk_col, color=True))
    ref = _bce_mean_ref(out_col, msk_col)
    np.testing.assert_allclose(np.asarray(got), np.asarray(ref), rtol=1e-5, atol=1e-6)

    # Ragged element count (600): exercises the XLA tail fold (no pad copy).
    out_rag = jax.nn.sigmoid(jax.random.normal(keys[4], (2, 3, 10, 10), jnp.float32))
    msk_rag = jax.random.uniform(keys[5], (2, 3, 10, 10), jnp.float32)
    got = jax.block_until_ready(cross_entropy(out_rag, msk_rag, color=True))
    ref = _bce_mean_ref(out_rag, msk_rag)
    np.testing.assert_allclose(np.asarray(got), np.asarray(ref), rtol=1e-5, atol=1e-6)

    # Small blocks: multi-block grid, "parallel" core split, clamped phantom
    # block with the in-kernel compute skip (rows=24, tile=8, nblocks=3).
    out_mb = jax.nn.sigmoid(jax.random.normal(keys[6], (3, 4, 32, 32), jnp.float32))
    msk_mb = (jax.random.uniform(keys[7], (3, 4, 32, 32)) > 0.5).astype(jnp.float32)
    got = jax.block_until_ready(_bce_mean_pallas(out_mb, msk_mb, block_bytes=16 * 1024))
    ref = _bce_mean_ref(out_mb, msk_mb)
    np.testing.assert_allclose(np.asarray(got), np.asarray(ref), rtol=1e-5, atol=1e-6)

    # Partial (overhanging) last block: rows=10 with tile_rows=8 -> the
    # row-index mask runs on the tail block only.
    out_pt = jax.nn.sigmoid(jax.random.normal(keys[8], (1, 1, 40, 128), jnp.float32))
    msk_pt = jax.random.uniform(keys[9], (1, 1, 40, 128), jnp.float32)
    got = jax.block_until_ready(_bce_mean_pallas(out_pt, msk_pt, block_bytes=16 * 1024))
    ref = _bce_mean_ref(out_pt, msk_pt)
    np.testing.assert_allclose(np.asarray(got), np.asarray(ref), rtol=1e-5, atol=1e-6)

    # bf16 inputs (exact for binary masks): 16-row sublane alignment and halved
    # HBM traffic; kernel computes in f32, so it matches the f32 reference run
    # on the same bf16 values.
    out_bf = jax.nn.sigmoid(
        jax.random.normal(keys[6], (2, 4, 64, 64), jnp.float32)).astype(jnp.bfloat16)
    msk_bf = (jax.random.uniform(keys[7], (2, 4, 64, 64)) > 0.5).astype(jnp.bfloat16)
    got = jax.block_until_ready(_bce_mean_pallas(out_bf, msk_bf, block_bytes=16 * 1024))
    ref = _bce_mean_ref(out_bf, msk_bf)
    np.testing.assert_allclose(np.asarray(got), np.asarray(ref), rtol=1e-5, atol=1e-6)

    print("KERNEL_OK")
</pallas_src>

<mosaic_0001>
module attributes {stable_mosaic.version = 11 : i64} {
  func.func @_bce_sum_kernel(%arg0: i32, %arg1: i32, %arg2: memref<8x512xf32, #tpu.memory_space<vmem>>, %arg3: memref<8x512xf32, #tpu.memory_space<vmem>>, %arg4: memref<8x512xf32, #tpu.memory_space<vmem>>) attributes {dimension_semantics = [#tpu.dimension_semantics<parallel>, #tpu.dimension_semantics<arbitrary>], iteration_bounds = array<i64: 1, 1>, scalar_prefetch = 0 : i64, scratch_operands = 0 : i64, tpu.core_type = #tpu.core_type<tc>, window_params = [{transform_indices = @transform_0, window_bounds = array<i64: 8, 512>}, {transform_indices = @transform_1, window_bounds = array<i64: 8, 512>}, {transform_indices = @transform_2, window_bounds = array<i64: 8, 512>}]} {
    %c1_i32 = arith.constant 1 : i32
    %0 = arith.muli %arg0, %c1_i32 : i32
    %1 = arith.addi %0, %arg1 : i32
    %c0_i32 = arith.constant 0 : i32
    %2 = arith.cmpi eq, %arg1, %c0_i32 : i32
    %3 = arith.extui %2 : i1 to i32
    %c0_i32_0 = arith.constant 0 : i32
    %4 = arith.cmpi ne, %3, %c0_i32_0 : i32
    scf.if %4 {
      %cst = arith.constant 0.000000e+00 : f32
      %8 = vector.broadcast %cst : f32 to vector<8x512xf32>
      %c0 = arith.constant 0 : index
      %c0_3 = arith.constant 0 : index
      %9 = vector.load %arg4[%c0, %c0_3] : memref<8x512xf32, #tpu.memory_space<vmem>>, vector<8x512xf32>
      tpu.vector_store %arg4[%c0, %c0_3], %8 {strides = array<i32>} : memref<8x512xf32, #tpu.memory_space<vmem>>, vector<8x512xf32>,
    } else {
    }
    %c1_i32_1 = arith.constant 1 : i32
    %5 = arith.cmpi slt, %1, %c1_i32_1 : i32
    %6 = arith.extui %5 : i1 to i32
    %c0_i32_2 = arith.constant 0 : i32
    %7 = arith.cmpi ne, %6, %c0_i32_2 : i32
    scf.if %7 {
      %c0 = arith.constant 0 : index
      %c0_3 = arith.constant 0 : index
      %8 = vector.load %arg2[%c0, %c0_3] : memref<8x512xf32, #tpu.memory_space<vmem>>, vector<8x512xf32>
      %c0_4 = arith.constant 0 : index
      %c0_5 = arith.constant 0 : index
      %9 = vector.load %arg3[%c0_4, %c0_5] : memref<8x512xf32, #tpu.memory_space<vmem>>, vector<8x512xf32>
      %10 = math.log %8 : vector<8x512xf32>
      %cst = arith.constant -1.000000e+02 : f32
      %11 = vector.broadcast %cst : f32 to vector<8x512xf32>
      %12 = arith.maximumf %10, %11 : vector<8x512xf32>
      %cst_6 = arith.constant 0.000000e+00 : f32
      %13 = vector.broadcast %cst_6 : f32 to vector<8x512xf32>
      %14 = arith.subf %13, %8 : vector<8x512xf32>
      %15 = math.log1p %14 : vector<8x512xf32>
      %cst_7 = arith.constant -1.000000e+02 : f32
      %16 = vector.broadcast %cst_7 : f32 to vector<8x512xf32>
      %17 = arith.maximumf %15, %16 : vector<8x512xf32>
      %18 = arith.subf %12, %17 : vector<8x512xf32>
      %19 = arith.mulf %9, %18 : vector<8x512xf32>
      %20 = arith.addf %17, %19 : vector<8x512xf32>
      %c0_i32_8 = arith.constant 0 : i32
      %21 = arith.cmpi eq, %1, %c0_i32_8 : i32
      %22 = arith.extui %21 : i1 to i32
      %c0_i32_9 = arith.constant 0 : i32
      %23 = arith.cmpi ne, %22, %c0_i32_9 : i32
      scf.if %23 {
        %27 = tpu.iota {dimensions = array<i32: 0>} : vector<8x512xi32>
        %c8_i32 = arith.constant 8 : i32
        %28 = arith.muli %1, %c8_i32 : i32
        %29 = vector.broadcast %28 : i32 to vector<8x512xi32>
        %30 = arith.addi %29, %27 : vector<8x512xi32>
        %c1_i32_11 = arith.constant 1 : i32
        %31 = vector.broadcast %c1_i32_11 : i32 to vector<8x512xi32>
        %32 = arith.cmpi slt, %30, %31 : vector<8x512xi32>
        %cst_12 = arith.constant 0.000000e+00 : f32
        %33 = vector.broadcast %cst_12 : f32 to vector<8x512xf32>
        %34 = arith.select %32, %20, %33 : vector<8x512xi1>, vector<8x512xf32>
        %c0_13 = arith.constant 0 : index
        %c0_14 = arith.constant 0 : index
        %35 = vector.load %arg4[%c0_13, %c0_14] : memref<8x512xf32, #tpu.memory_space<vmem>>, vector<8x512xf32>
        %36 = vector.shape_cast %34 : vector<8x512xf32> to vector<1x8x512xf32>
        %cst_15 = arith.constant dense<0.000000e+00> : vector<8x512xf32>
        %37 = vector.multi_reduction <add>, %36, %cst_15 [0] : vector<1x8x512xf32> to vector<8x512xf32>
        %38 = arith.addf %35, %37 : vector<8x512xf32>
        %c0_16 = arith.constant 0 : index
        %c0_17 = arith.constant 0 : index
        %39 = vector.load %arg4[%c0_16, %c0_17] : memref<8x512xf32, #tpu.memory_space<vmem>>, vector<8x512xf32>
        tpu.vector_store %arg4[%c0_16, %c0_17], %38 {strides = array<i32>} : memref<8x512xf32, #tpu.memory_space<vmem>>, vector<8x512xf32>,
      } else {
      }
      %true = arith.constant true
      %24 = arith.xori %21, %true : i1
      %25 = arith.extui %24 : i1 to i32
      %c0_i32_10 = arith.constant 0 : i32
      %26 = arith.cmpi ne, %25, %c0_i32_10 : i32
      scf.if %26 {
        %c0_11 = arith.constant 0 : index
        %c0_12 = arith.constant 0 : index
        %27 = vector.load %arg4[%c0_11, %c0_12] : memref<8x512xf32, #tpu.memory_space<vmem>>, vector<8x512xf32>
        %28 = vector.shape_cast %20 : vector<8x512xf32> to vector<1x8x512xf32>
        %cst_13 = arith.constant dense<0.000000e+00> : vector<8x512xf32>
        %29 = vector.multi_reduction <add>, %28, %cst_13 [0] : vector<1x8x512xf32> to vector<8x512xf32>
        %30 = arith.addf %27, %29 : vector<8x512xf32>
        %c0_14 = arith.constant 0 : index
        %c0_15 = arith.constant 0 : index
        %31 = vector.load %arg4[%c0_14, %c0_15] : memref<8x512xf32, #tpu.memory_space<vmem>>, vector<8x512xf32>
        tpu.vector_store %arg4[%c0_14, %c0_15], %30 {strides = array<i32>} : memref<8x512xf32, #tpu.memory_space<vmem>>, vector<8x512xf32>,
      } else {
      }
    } else {
    }
    return
  }
  func.func @transform_0(%arg0: i32, %arg1: i32) -> (i32, i32) {
    %c1_i32 = arith.constant 1 : i32
    %0 = arith.muli %arg0, %c1_i32 : i32
    %1 = arith.addi %0, %arg1 : i32
    %c0_i32 = arith.constant 0 : i32
    %2 = arith.minsi %1, %c0_i32 : i32
    %c0_i32_0 = arith.constant 0 : i32
    %c0_i32_1 = arith.constant 0 : i32
    return %2, %c0_i32_0 : i32, i32
  }
  func.func @transform_1(%arg0: i32, %arg1: i32) -> (i32, i32) {
    %c1_i32 = arith.constant 1 : i32
    %0 = arith.muli %arg0, %c1_i32 : i32
    %1 = arith.addi %0, %arg1 : i32
    %c0_i32 = arith.constant 0 : i32
    %2 = arith.minsi %1, %c0_i32 : i32
    %c0_i32_0 = arith.constant 0 : i32
    %c0_i32_1 = arith.constant 0 : i32
    return %2, %c0_i32_0 : i32, i32
  }
  func.func @transform_2(%arg0: i32, %arg1: i32) -> (i32, i32) {
    %c0_i32 = arith.constant 0 : i32
    %c0_i32_0 = arith.constant 0 : i32
    return %arg0, %c0_i32 : i32, i32
  }
}

</mosaic_0001>

<bundles_post_ra>
// kernel: tpu_custom_call.1
= control target key start
LH: loop header
LB: loop body
LE: loop exit
PB: predicated region body
PF: predicated region fallthrough
CT: control target
= control target key end

     0   :  { %7 = vsyncpa [#allocation3], 0  ;;  %s691_s0 = inlined_call_operand.hbm [shape: f32[1,512], index: 0, kind: input, shape index: {}]   ;;  %s692_s1 = inlined_call_operand.hbm [shape: f32[1,512], index: 1, kind: input, shape index: {}]   ;;  %s693_s2 = inlined_call_operand.hbm [shape: f32[8,512], index: 2, kind: output, shape index: {}]  }
   0x1   :  { %8 = vsyncpa [#allocation6], 0 }
   0x2   :  { %9 = vsyncpa [#allocation4], 0 }
   0x3   :  { %21 = vsyncadd [#allocation3], 448  ;;  %s582_s9 = smov [#allocation2]  }
   0x4   :  { %s27_s10 = sshll.u32 %s582_s9, 4  ;;  %s28_s10 = int_to_ptr.vmem [resolvable:$true] %s27_s10 }
   0x5   :  { %s524_s11 = scalar_lea.vmem %s28_s10, 64  ;;  %s528_s12 = scalar_lea.vmem %s28_s10, 512 }
   0x6   :  { %p525_p0 = scmp.ne.s32.totalorder %s28_s10, %s524_s11  ;;  %p529_p1 = scmp.lt.s32.totalorder %s28_s10, %s28_s10 }
   0x7   :  { %p530_p2 = scmp.lt.s32.totalorder %s528_s12, %s524_s11 }
   0x9   :  { %p531_p3 = por %p530_p2, %p529_p1 }
   0xb   :  { %p532_p4 = pnand %p531_p3, %p525_p0 }
   0xd   :  { %535 = shalt.err (!%p532_p4)
}
   0xe   :  { %s583_s13 = smov 64   ;;  %s584_s14 = smov 4  }
   0xf   :  { %33 = dma.hbm_to_vmem [thread:$0]  %s691_s0, 64, %s28_s10, [#allocation3], %s583_s13, %s583_s13, %s584_s14  }
  0x10   :  { %45 = vsyncadd [#allocation6], 448  ;;  %s585_s17 = smov [#allocation5]  }
  0x11   :  { %s51_s18 = sshll.u32 %s585_s17, 4  ;;  %s52_s18 = int_to_ptr.vmem [resolvable:$true] %s51_s18 }
  0x12   :  { %s544_s19 = scalar_lea.vmem %s52_s18, 64  ;;  %s548_s20 = scalar_lea.vmem %s52_s18, 512 }
  0x13   :  { %p545_p5 = scmp.ne.s32.totalorder %s52_s18, %s544_s19  ;;  %p549_p6 = scmp.lt.s32.totalorder %s52_s18, %s52_s18 }
  0x14   :  { %p550_p7 = scmp.lt.s32.totalorder %s548_s20, %s544_s19 }
  0x16   :  { %p551_p8 = por %p550_p7, %p549_p6 }
  0x18   :  { %p552_p9 = pnand %p551_p8, %p545_p5 }
  0x1a   :  { %555 = shalt.err (!%p552_p9)
}
  0x1b   :  { %57 = dma.hbm_to_vmem [thread:$0]  %s692_s1, 64, %s52_s18, [#allocation6], %s583_s13, %s583_s13, %s584_s14  }
  0x1c   :  { %576 = dma.done.wait [#allocation3], 512  }
  0x1d   :  { %577 = vsyncadd [#allocation3], 4294966784 }
  0x1e   :  { %578 = dma.done.wait [#allocation6], 512  }
  0x1f   :  { %579 = vsyncadd [#allocation6], 4294966784  ;;  %v91_v0 = vld [vmem:[#allocation2] sm:$0xf]  ;;  %v92_v1 = vld [vmem:[#allocation2 + $0x4] sm:$0xf]  ;;  %v247_v14 = vlaneseq }
  0x20   :  { %v93_v2 = vld [vmem:[#allocation2 + $0x8] sm:$0xf]  ;;  %484 = vlog2.f32 %v91_v0  ;;  %v94_v3 = vld [vmem:[#allocation2 + $0xc] sm:$0xf]  ;;  %v131_v4 = vsub.f32 0.0, %v91_v0  ;;  %v132_v5 = vsub.f32 0.0, %v92_v1 }
  0x21   :  { %486 = vlog2.f32 %v92_v1  ;;  %v133_v6 = vsub.f32 0.0, %v93_v2  ;;  %v95_v7 = vld [vmem:[#allocation2 + $0x10] sm:$0xf]  ;;  %v96_v8 = vld [vmem:[#allocation2 + $0x14] sm:$0xf]  ;;  %v134_v10 = vsub.f32 0.0, %v94_v3 }
  0x22   :  { %488 = vlog2.f32 %v93_v2  ;;  %v139_v9 = vadd.f32 1.0, %v131_v4  ;;  %v148_v11 = vadd.f32 1.0, %v132_v5  ;;  %v609_v12 = vsub.f32 0.0, %v95_v7  ;;  %v97_v15 = vld [vmem:[#allocation2 + $0x18] sm:$0xf]  ;;  %s587_s0 = smov [#allocation7]  }
  0x23   :  { %490 = vlog2.f32 %v94_v3  ;;  %v157_v13 = vadd.f32 1.0, %v133_v6  ;;  %v142_v16 = vmul.f32 -0.5, %v131_v4  ;;  %v611_v17 = vsub.f32 0.0, %v96_v8  ;;  %v98_v20 = vld [vmem:[#allocation2 + $0x1c] sm:$0xf]  ;;  %s463_s1 = sshll.u32 %s587_s0, 4  ;;  %s464_s1 = int_to_ptr.vmem [resolvable:$true] %s463_s1 }
  0x24   :  { %492 = vlog2.f32 %v95_v7  ;;  %v151_v18 = vmul.f32 -0.5, %v132_v5  ;;  %v166_v19 = vadd.f32 1.0, %v134_v10  ;;  %v160_v21 = vmul.f32 -0.5, %v133_v6  ;;  %v103_v57 = vld [vmem:[#allocation5 + $0x10] sm:$0xf]  ;;  %s556_s23 = scalar_lea.vmem %s464_s1, 512  ;;  %p561_p11 = scmp.lt.s32.totalorder %s464_s1, %s464_s1 }
  0x25   :  { %494 = vlog2.f32 %v96_v8  ;;  %v175_v22 = vadd.f32 1.0, %v609_v12  ;;  %v586_v23 = vmov 1966171168   ;;  %v616_v25 = vsub.f32 0.0, %v97_v15  ;;  %p557_p10 = scmp.ne.s32.totalorder %s464_s1, %s556_s23  ;;  %p562_p12 = scmp.lt.s32.totalorder %s556_s23, %s556_s23 }
  0x26   :  { %496 = vlog2.f32 %v139_v9  ;;  %v614_v24 = vunpack.c.l.s4 %v586_v23  ;;  %v169_v26 = vmul.f32 -0.5, %v134_v10  ;;  %v618_v27 = vshrl.u32 %v247_v14, 7 }
  0x27   :  { %498 = vlog2.f32 %v148_v11  ;;  %v143_v29 = vadd.f32 1.0, %v142_v16  ;;  %v145_v30 = vand.u32 2147483647, %v131_v4  ;;  %v154_v31 = vand.u32 2147483647, %v132_v5  ;;  %p563_p13 = por %p562_p12, %p561_p11 }
  0x28   :  { %500 = vlog2.f32 %v157_v13  ;;  %v620_v33 = vsub.f32 0.0, %v98_v20  ;;  %v152_v34 = vadd.f32 1.0, %v151_v18  ;;  %v178_v35 = vmul.f32 -0.5, %v609_v12 }
  0x29   :  { %502 = vlog2.f32 %v97_v15  ;;  %v184_v36 = vadd.f32 1.0, %v611_v17  ;;  %v161_v38 = vadd.f32 1.0, %v160_v21  ;;  %v163_v39 = vand.u32 2147483647, %v133_v6  ;;  %p564_p0 = pnand %p563_p13, %p557_p10 }
  0x2a   :  { %504 = vlog2.f32 %v166_v19  ;;  %v172_v40 = vand.u32 2147483647, %v134_v10  ;;  %v170_v42 = vadd.f32 1.0, %v169_v26  ;;  %v181_v43 = vand.u32 2147483647, %v609_v12 }
  0x2b   :  { %506 = vlog2.f32 %v175_v22  ;;  %v144_v46 = vmul.f32 %v143_v29, %v131_v4  ;;  %vm625_vm0 = vcmp.lt.f32.partialorder %v145_v30, 0.0004427343  ;;  %vm629_vm1 = vcmp.lt.f32.partialorder %v154_v31, 0.0004427343  ;;  %v99_v26 = vld [vmem:[#allocation5] sm:$0xf] }
  0x2c   :  { %508 = vlog2.f32 %v98_v20  ;;  %v153_v51 = vmul.f32 %v152_v34, %v132_v5  ;;  %v179_v52 = vadd.f32 1.0, %v178_v35  ;;  %v193_v53 = vadd.f32 1.0, %v616_v25 }
  0x2d   :  { %v485_v28 = vpop.eup %484  ;;  %510 = vlog2.f32 %v184_v36  ;;  %v162_v55 = vmul.f32 %v161_v38, %v133_v6  ;;  %vm634_vm2 = vcmp.lt.f32.partialorder %v163_v39, 0.0004427343  ;;  %vm638_vm3 = vcmp.lt.f32.partialorder %v172_v40, 0.0004427343  ;;  %v101_v39 = vld [vmem:[#allocation5 + $0x8] sm:$0xf] }
  0x2e   :  { %v487_v32 = vpop.eup %486  ;;  %v108_v41 = vmul.f32 0.6931472, %v485_v28  ;;  %v187_v58 = vmul.f32 -0.5, %v611_v17  ;;  %v171_v61 = vmul.f32 %v170_v42, %v134_v10  ;;  %vm643_vm4 = vcmp.lt.f32.partialorder %v181_v43, 0.0004427343 }
  0x2f   :  { %v489_v37 = vpop.eup %488  ;;  %v110_v45 = vmul.f32 0.6931472, %v487_v32  ;;  %512 = vlog2.f32 %v193_v53  ;;  %v202_v3 = vadd.f32 1.0, %v620_v33  ;;  %v180_v8 = vmul.f32 %v179_v52, %v609_v12  ;;  %v100_v32 = vld [vmem:[#allocation5 + $0x4] sm:$0xf] }
  0x30   :  { %v491_v44 = vpop.eup %490  ;;  %v112_v50 = vmul.f32 0.6931472, %v489_v37  ;;  %v123_v60 = vmax.f32 %v108_v41, -100.0  ;;  %v188_v13 = vadd.f32 1.0, %v187_v58  ;;  %v190_v15 = vand.u32 2147483647, %v611_v17 }
  0x31   :  { %v493_v49 = vpop.eup %492  ;;  %v114_v0 = vmul.f32 0.6931472, %v491_v44  ;;  %v124_v1 = vmax.f32 %v110_v45, -100.0  ;;  %514 = vlog2.f32 %v202_v3  ;;  %v196_v16 = vmul.f32 -0.5, %v616_v25  ;;  %v102_v40 = vld [vmem:[#allocation5 + $0xc] sm:$0xf] }
  0x32   :  { %v495_v54 = vpop.eup %494  ;;  %v116_v5 = vmul.f32 0.6931472, %v493_v49  ;;  %v125_v6 = vmax.f32 %v112_v50, -100.0  ;;  %v205_v30 = vmul.f32 -0.5, %v620_v33  ;;  %v189_v42 = vmul.f32 %v188_v13, %v611_v17 }
  0x33   :  { %v497_v59 = vpop.eup %496  ;;  %v118_v20 = vmul.f32 0.6931472, %v495_v54  ;;  %v126_v21 = vmax.f32 %v114_v0, -100.0  ;;  %v197_v43 = vadd.f32 1.0, %v196_v16  ;;  %vm663_vm5 = vcmp.lt.f32.partialorder %v190_v15, 0.0004427343 }
  0x34   :  { %v499_v63 = vpop.eup %498  ;;  %v141_v2 = vmul.f32 0.6931472, %v497_v59  ;;  %v127_v34 = vmax.f32 %v116_v5, -100.0  ;;  %v199_v48 = vand.u32 2147483647, %v616_v25  ;;  %v206_v52 = vadd.f32 1.0, %v205_v30 }
  0x35   :  { %v501_v4 = vpop.eup %500  ;;  %v150_v7 = vmul.f32 0.6931472, %v499_v63  ;;  %v128_v50 = vmax.f32 %v118_v20, -100.0  ;;  %v208_v54 = vand.u32 2147483647, %v620_v33  ;;  %v198_v59 = vmul.f32 %v197_v43, %v616_v25 }
  0x36   :  { %v503_v9 = vpop.eup %502  ;;  %v147_v10 = vsel %vm625_vm0, %v144_v46, %v141_v2  ;;  %v159_v11 = vmul.f32 0.6931472, %v501_v4  ;;  %v104_v63 = vld [vmem:[#allocation5 + $0x14] sm:$0xf]  ;;  %vm672_vm6 = vcmp.lt.f32.partialorder %v199_v48, 0.0004427343  ;;  %v267_v3 = vunpack.c.0.s8 %v614_v24 }
  0x37   :  { %v156_v14 = vsel %vm629_vm1, %v153_v51, %v150_v7  ;;  %v211_v18 = vmax.f32 %v147_v10, -100.0  ;;  %v505_v19 = vpop.eup %504  ;;  %v120_v28 = vmul.f32 0.6931472, %v503_v9  ;;  %v207_v7 = vmul.f32 %v206_v52, %v620_v33 }
  0x38   :  { %v165_v12 = vsel %vm634_vm2, %v162_v55, %v159_v11  ;;  %v212_v22 = vmax.f32 %v156_v14, -100.0  ;;  %v507_v23 = vpop.eup %506  ;;  %v168_v29 = vmul.f32 0.6931472, %v505_v19  ;;  %vm678_vm7 = vcmp.lt.f32.partialorder %v208_v54, 0.0004427343 }
  0x39   :  { %v213_v31 = vmax.f32 %v165_v12, -100.0  ;;  %v177_v35 = vmul.f32 0.6931472, %v507_v23  ;;  %v219_v36 = vsub.f32 %v123_v60, %v211_v18  ;;  %v509_v38 = vpop.eup %508  ;;  %v129_v5 = vmax.f32 %v120_v28, -100.0 }
  0x3a   :  { %v220_v37 = vsub.f32 %v124_v1, %v212_v22  ;;  %v174_v41 = vsel %vm638_vm3, %v171_v61, %v168_v29  ;;  %v511_v45 = vpop.eup %510  ;;  %v122_v4 = vmul.f32 0.6931472, %v509_v38  ;;  %vm252_vm8 = vcmp.lt.s32.totalorder %v618_v27, 1 }
  0x3b   :  { %v221_v44 = vsub.f32 %v125_v6, %v213_v31  ;;  %v183_v46 = vsel %vm643_vm4, %v180_v8, %v177_v35  ;;  %v214_v49 = vmax.f32 %v174_v41, -100.0  ;;  %v186_v51 = vmul.f32 0.6931472, %v511_v45 }
  0x3c   :  { %v215_v53 = vmax.f32 %v183_v46, -100.0  ;;  %v227_v55 = vmul.f32 %v219_v36, %v99_v26  ;;  %v228_v56 = vmul.f32 %v220_v37, %v100_v32  ;;  %v513_v62 = vpop.eup %512  ;;  %v130_v12 = vmax.f32 %v122_v4, -100.0  ;;  %v106_v32 = vld [vmem:[#allocation5 + $0x1c] sm:$0xf] }
  0x3d   :  { %v222_v17 = vsub.f32 %v126_v21, %v214_v49  ;;  %v192_v58 = vsel %vm663_vm5, %v189_v42, %v186_v51  ;;  %v229_v61 = vmul.f32 %v221_v44, %v101_v39  ;;  %v195_v6 = vmul.f32 0.6931472, %v513_v62  ;;  %v105_v21 = vld [vmem:[#allocation5 + $0x18] sm:$0xf] }
  0x3e   :  { %v223_v60 = vsub.f32 %v127_v34, %v215_v53  ;;  %v216_v1 = vmax.f32 %v192_v58, -100.0  ;;  %v235_v9 = vadd.f32 %v227_v55, %v211_v18  ;;  %v236_v10 = vadd.f32 %v228_v56, %v212_v22  ;;  %v515_v11 = vpop.eup %514 }
  0x3f   :  { %v230_v2 = vmul.f32 %v222_v17, %v102_v40  ;;  %v201_v13 = vsel %vm672_vm6, %v198_v59, %v195_v6  ;;  %v237_v15 = vadd.f32 %v229_v61, %v213_v31  ;;  %v204_v24 = vmul.f32 0.6931472, %v515_v11 }
  0x40   :  { %v224_v25 = vsub.f32 %v128_v50, %v216_v1  ;;  %v231_v14 = vmul.f32 %v223_v60, %v103_v57  ;;  %v217_v19 = vmax.f32 %v201_v13, -100.0  ;;  %v261_v26 = vcombine.low %v235_v9, %v236_v10 }
  0x41   :  { %v238_v16 = vadd.f32 %v230_v2, %v214_v49  ;;  %v210_v33 = vsel %vm678_vm7, %v207_v7, %v204_v24  ;;  %v270_v18 = vsub.s32 %v267_v3, %v618_v27 }
  0x42   :  { %v232_v20 = vmul.f32 %v224_v25, %v104_v63  ;;  %v225_v23 = vsub.f32 %v129_v5, %v217_v19  ;;  %v218_v22 = vmax.f32 %v210_v33, -100.0  ;;  %v239_v28 = vadd.f32 %v231_v14, %v215_v53 }
  0x43   :  { %v262_v30 = vcombine.low %v237_v15, %v238_v16  ;;  %v271_v35 = vrot.slane %v261_v26, %v270_v18 }
  0x44   :  { %v240_v29 = vadd.f32 %v232_v20, %v216_v1  ;;  %v233_v34 = vmul.f32 %v225_v23, %v105_v21  ;;  %v226_v31 = vsub.f32 %v130_v12, %v218_v22 }
  0x45   :  { %v278_v39 = vrot.slane %v262_v30, %v270_v18 }
  0x46   :  { %v234_v36 = vmul.f32 %v226_v31, %v106_v32  ;;  %v241_v37 = vadd.f32 %v233_v34, %v217_v19  ;;  %v263_v38 = vcombine.low %v239_v28, %v240_v29 }
  0x47   :  { %v293_v43 = vcombine.low %v271_v35, %v278_v39  ;;  %v294_v44 = vcombine.high %v271_v35, %v278_v39 }
  0x48   :  { %v242_v40 = vadd.f32 %v234_v36, %v218_v22  ;;  %v285_v42 = vrot.slane %v263_v38, %v270_v18 }
  0x49   :  { %v303_v47 = vrot.slane %v293_v43, %v270_v18  ;;  %v310_v49 = vrot.slane %v294_v44, %v270_v18 }
  0x4a   :  { %v264_v41 = vcombine.low %v241_v37, %v242_v40 }
  0x4c   :  { %v292_v45 = vrot.slane %v264_v41, %v270_v18 }
  0x4e   :  { %v295_v46 = vcombine.low %v285_v42, %v292_v45  ;;  %v296_v48 = vcombine.high %v285_v42, %v292_v45 }
  0x50   :  { %v317_v50 = vrot.slane %v295_v46, %v270_v18  ;;  %v324_v51 = vrot.slane %v296_v48, %v270_v18 }
  0x52   :  { %v325_v52 = vcombine.low %v303_v47, %v317_v50  ;;  %v327_v53 = vcombine.low %v310_v49, %v324_v51  ;;  %v326_v54 = vcombine.high %v303_v47, %v317_v50  ;;  %v328_v17 = vcombine.high %v310_v49, %v324_v51 }
  0x54   :  { %v333_v55 = vsel %vm252_vm8, %v325_v52, 0.0  ;;  %v334_v56 = vsel %vm252_vm8, %v327_v53, 0.0  ;;  %v335_v57 = vsel %vm252_vm8, %v326_v54, 0.0  ;;  %v336_v58 = vsel %vm252_vm8, %v328_v17, 0.0 }
  0x55   :  { %349 = vst [vmem:[#allocation7] sm:$0xff] %v333_v55  ;;  %350 = vst [vmem:[#allocation7 + $0x8] sm:$0xff] %v334_v56 }
  0x56   :  { %351 = vst [vmem:[#allocation7 + $0x10] sm:$0xff] %v335_v57  ;;  %352 = vst [vmem:[#allocation7 + $0x18] sm:$0xff] %v336_v58 }
  0x57   :  { %567 = shalt.err (!%p564_p0)
}
  0x58   :  { %466 = dma.vmem_to_hbm [thread:$0]  %s464_s1, 512, %s693_s2, [#allocation4]  }
  0x59   :  { %580 = dma.done.wait [#allocation4], 512  }
  0x5a   :  { %581 = vsyncadd [#allocation4], 4294966784 }
  0x5b   :  { %470 = vsyncpa [#allocation3], 1 }
  0x5c   :  { %471 = vsyncpa [#allocation6], 1 }
  0x5d   :  { %472 = vsyncpa [#allocation4], 1 }

</bundles_post_ra>
